<compile_context>
chip_gen: v7x
topology: tpu7x:2x2x1
jax: 0.10.0
libtpu: 0.0.40
codegen_flags: <defaults>
</compile_context>

<pallas_src>
import functools

import jax
import jax.numpy as jnp
from jax.experimental import pallas as pl
from jax.experimental.pallas import tpu as pltpu

BN_EPS = 1e-5
# Scoped-VMEM target.  v7x note: 64 MiB physical -> keep <= ~48 MiB there;
# v5e/v6e (128 MiB physical) can raise this for production channel counts.
DEFAULT_VMEM_BUDGET = 32 * 1024 * 1024


def _round_up(x, m):
    return ((x + m - 1) // m) * m


def _cdiv(a, b):
    return -(-a // b)


def stats_kernel(x_ref, s_ref, g_ref):
    """Per-TensorCore partial column-sum and Gram of the flattened input.

    x_ref: (Cin, TM)  lane-dense tile of X.
    s_ref: (Cin, 1)   partial  sum_m x[c, m]
    g_ref: (Cin, Cin) partial  sum_m x[c, m] * x[c', m]
    Accumulators are resident across the trailing "arbitrary" grid axis; the
    leading "parallel" axis gives each v7x TensorCore its own partial.
    Zero-padded columns contribute exactly zero to both accumulators.
    """
    @pl.when(pl.program_id(1) == 0)
    def _():
        s_ref[...] = jnp.zeros_like(s_ref)
        g_ref[...] = jnp.zeros_like(g_ref)

    x = x_ref[...]
    s_ref[...] += jnp.sum(x, axis=1, keepdims=True)
    # Gram contracting the long lane axis of both operands (attention-style
    # q @ k^T); avoids materializing y = W @ X just to take its statistics.
    g_ref[...] += jax.lax.dot_general(
        x, x, (((1,), (1,)), ((), ())), preferred_element_type=jnp.float32)


def norm_kernel(inv_m, w_ref, sum_ref, ssq_ref, gamma_ref, beta_ref, x_ref, o_ref):
    """Recompute y = W @ x per tile with BatchNorm folded into the weights.

    The BN fold is recomputed in the prologue each grid step - O(Cout)
    elementwise work, negligible next to the (Cout, TM) matmul - which keeps
    scale/shift/w_scaled out of HBM entirely.
    """
    mean = sum_ref[...] * inv_m                                  # (Cout, 1)
    # Single-pass var = E[y^2] - E[y]^2 with f32 accumulators, clamped at 0.
    # TODO(synk): switch to a centered/Welford accumulation if activations are
    # far from zero-mean (catastrophic-cancellation risk flagged in review).
    var = jnp.maximum(ssq_ref[...] * inv_m - mean * mean, 0.0)   # (Cout, 1)
    scale = gamma_ref[...] * jax.lax.rsqrt(var + BN_EPS)         # (Cout, 1)
    shift = beta_ref[...] - mean * scale                         # (Cout, 1)
    y = jnp.dot(w_ref[...] * scale, x_ref[...],
                preferred_element_type=jnp.float32)              # (Cout, TM)
    o_ref[...] = (y + shift).astype(o_ref.dtype)


def downsample_b(x_nchw, conv_weight, mask, gamma, beta, stride, *,
                 tm_max=32768, vmem_budget_bytes=DEFAULT_VMEM_BUDGET):
    """x_nchw: (N, Cin, H, W); conv_weight/mask: (Cout, Cin, 1, 1);
    gamma/beta: (Cout,). Returns (N, Cout, H', W') matching the PyTorch forward."""
    n, cin, _, _ = x_nchw.shape
    cout = conv_weight.shape[0]

    # 1x1 conv with stride s == strided spatial subsample + channel mix.
    # TODO(synk): the strided slice + leading-dim transpose + reshape below is
    # wrapper-side XLA data movement (one extra HBM round-trip of the
    # subsampled input).  Folding the H/W stride into the kernel index_map
    # would remove it but forces a lane-sparse (W'-wide) compute/output layout,
    # which is worse at CIFAR-sized spatial dims; kept as layout plumbing.
    x_s = x_nchw[:, :, ::stride, ::stride]                     # (N, Cin, H', W')
    hp, wp = x_s.shape[2], x_s.shape[3]
    m = n * hp * wp
    x_mat = jnp.transpose(x_s, (1, 0, 2, 3)).reshape(cin, m)   # (Cin, M) lane-dense

    # ---- tile size: biggest M tile the VMEM budget allows, even tile count --
    # Phase 2 dominates VMEM: double-buffered (Cin,TM) input + (Cout,TM) output
    # blocks; keep them under ~half the scoped budget (large tiles amortize the
    # ~0.35us per-grid-step overhead).  Even tile count keeps both v7x
    # TensorCores busy.
    bytes_per_col = 2 * (cin + cout) * 4            # double-buffered, f32
    tm_cap = max(128, ((vmem_budget_bytes // 2) // bytes_per_col) // 128 * 128)
    tm_cap = min(tm_cap, tm_max)
    num_pairs = max(1, _cdiv(m, 2 * tm_cap))
    tm_eff = min(tm_cap, max(128, _round_up(_cdiv(m, 2 * num_pairs), 128)))
    m_pad = _round_up(m, 2 * tm_eff)
    if m_pad != m:
        # Zero columns contribute nothing to the stats; sliced off the output.
        x_mat = jnp.pad(x_mat, ((0, 0), (0, m_pad - m)))
    num_tiles = m_pad // tm_eff                     # even by construction
    half = num_tiles // 2

    # Gated weights: mask multiply hoisted out of the kernels (done once).
    # NOTE: for production ResNet channel counts, additionally tile Cout/Cin to
    # MXU multiples (256 on v6e/v7x, 128 on v5e); unnecessary at these shapes.
    w_mat = (conv_weight * mask)[:, :, 0, 0].astype(jnp.float32)   # (Cout, Cin)

    # ---- phase 1: per-channel column sum + Gram of X, split over 2 cores ----
    s_parts, g_parts = pl.pallas_call(
        stats_kernel,
        out_shape=(jax.ShapeDtypeStruct((2, cin, 1), jnp.float32),
                   jax.ShapeDtypeStruct((2, cin, cin), jnp.float32)),
        grid=(2, half),
        in_specs=[pl.BlockSpec((cin, tm_eff), lambda c, i: (0, c * half + i))],
        out_specs=(pl.BlockSpec((None, cin, 1), lambda c, i: (c, 0, 0)),
                   pl.BlockSpec((None, cin, cin), lambda c, i: (c, 0, 0))),
        compiler_params=pltpu.CompilerParams(
            dimension_semantics=("parallel", "arbitrary"),
            vmem_limit_bytes=vmem_budget_bytes),
        cost_estimate=pl.CostEstimate(
            flops=(2 * cin * cin + cin) * m_pad,
            transcendentals=0,
            bytes_accessed=4 * (cin * m_pad + 2 * (cin * cin + cin))),
    )(x_mat)

    # ---- fold Gram stats into per-output-channel sum / sum-of-squares -------
    # Tiny exact folds:  sum_y = W s,   ssq_y[o] = (W G W^T)[o,o] = rowsum((W G)*W).
    s_tot = jnp.sum(s_parts, axis=0)                                   # (Cin, 1)
    g_tot = jnp.sum(g_parts, axis=0)                                   # (Cin, Cin)
    sum_y = w_mat @ s_tot                                              # (Cout, 1)
    ssq_y = jnp.sum((w_mat @ g_tot) * w_mat, axis=1, keepdims=True)    # (Cout, 1)

    gamma_c = gamma.reshape(cout, 1).astype(jnp.float32)
    beta_c = beta.reshape(cout, 1).astype(jnp.float32)

    # ---- phase 2: y = W @ x per tile with BN folded into the weights --------
    out_mat = pl.pallas_call(
        functools.partial(norm_kernel, float(1.0 / m)),    # real M, not padded
        out_shape=jax.ShapeDtypeStruct((cout, m_pad), x_nchw.dtype),
        grid=(num_tiles,),
        in_specs=[
            pl.BlockSpec((cout, cin), lambda i: (0, 0)),
            pl.BlockSpec((cout, 1), lambda i: (0, 0)),
            pl.BlockSpec((cout, 1), lambda i: (0, 0)),
            pl.BlockSpec((cout, 1), lambda i: (0, 0)),
            pl.BlockSpec((cout, 1), lambda i: (0, 0)),
            pl.BlockSpec((cin, tm_eff), lambda i: (0, i)),
        ],
        out_specs=pl.BlockSpec((cout, tm_eff), lambda i: (0, i)),
        compiler_params=pltpu.CompilerParams(
            dimension_semantics=("parallel",),
            vmem_limit_bytes=vmem_budget_bytes),
        cost_estimate=pl.CostEstimate(
            flops=(2 * cout * cin + 2 * cout) * m_pad,
            transcendentals=0,
            bytes_accessed=4 * ((cin + cout) * m_pad + cout * (cin + 4))),
    )(w_mat, sum_y, ssq_y, gamma_c, beta_c, x_mat)

    # Padded columns hold y = shift (not 0); slice them off before reshaping.
    out = out_mat[:, :m].reshape(cout, n, hp, wp)
    # TODO(synk): BatchNorm running_mean/running_var momentum update (training
    # state side effect) is not emitted; the forward output matches PyTorch.
    # Leading-dim transpose back to NCHW (module contract).
    return jnp.transpose(out, (1, 0, 2, 3))


def reference(x_nchw, conv_weight, mask, gamma, beta, stride):
    """Pure-JAX reference of the PyTorch forward (training-mode BN)."""
    x_s = x_nchw[:, :, ::stride, ::stride]
    w = (conv_weight * mask)[:, :, 0, 0]                       # (Cout, Cin)
    y = jnp.einsum('nchw,oc->nohw', x_s, w)
    mean = jnp.mean(y, axis=(0, 2, 3), keepdims=True)
    var = jnp.mean((y - mean) ** 2, axis=(0, 2, 3), keepdims=True)
    yhat = (y - mean) / jnp.sqrt(var + BN_EPS)
    return yhat * gamma.reshape(1, -1, 1, 1) + beta.reshape(1, -1, 1, 1)


if __name__ == "__main__":
    key = jax.random.PRNGKey(0)
    k_x, k_w, k_x2, k_g, k_b, k_x3 = jax.random.split(key, 6)

    # --- primary small test (spec shapes, PyTorch-default BN params) ---------
    N, Cin, H, W = 2, 4, 16, 16
    Cout, stride = 8, 2

    x = jax.random.normal(k_x, (N, Cin, H, W), dtype=jnp.float32)

    # Deterministic params mirroring PyTorch defaults:
    #  Conv2d kaiming_uniform(a=sqrt(5)) -> U(-1/sqrt(fan_in), 1/sqrt(fan_in)),
    #  GatedConv2d mask = ones, BatchNorm2d weight=1 / bias=0.
    fan_in = Cin * 1 * 1
    bound = 1.0 / (fan_in ** 0.5)
    conv_weight = jax.random.uniform(
        k_w, (Cout, Cin, 1, 1), minval=-bound, maxval=bound, dtype=jnp.float32)
    mask = jnp.ones((Cout, Cin, 1, 1), dtype=jnp.float32)
    gamma = jnp.ones((Cout,), dtype=jnp.float32)
    beta = jnp.zeros((Cout,), dtype=jnp.float32)

    out = jax.block_until_ready(
        downsample_b(x, conv_weight, mask, gamma, beta, stride))
    ref = reference(x, conv_weight, mask, gamma, beta, stride)
    assert out.shape == (N, Cout, H // stride, W // stride), out.shape
    assert jnp.allclose(out, ref, atol=1e-4, rtol=1e-4), \
        float(jnp.max(jnp.abs(out - ref)))

    # --- multi-tile test: forces 4 tiles (half=2) so both the per-core
    #     accumulation loop and the parallel split are exercised; non-default
    #     gamma/beta exercise the in-kernel BN fold.
    N2, H2, W2 = 4, 32, 32                      # M = 4*16*16 = 1024
    x2 = jax.random.normal(k_x2, (N2, Cin, H2, W2), dtype=jnp.float32)
    gamma2 = 1.0 + 0.1 * jax.random.normal(k_g, (Cout,), dtype=jnp.float32)
    beta2 = 0.1 * jax.random.normal(k_b, (Cout,), dtype=jnp.float32)
    out2 = jax.block_until_ready(
        downsample_b(x2, conv_weight, mask, gamma2, beta2, stride, tm_max=256))
    ref2 = reference(x2, conv_weight, mask, gamma2, beta2, stride)
    assert jnp.allclose(out2, ref2, atol=1e-4, rtol=1e-4), \
        float(jnp.max(jnp.abs(out2 - ref2)))

    # --- stride=1 path --------------------------------------------------------
    x3 = jax.random.normal(k_x3, (2, Cin, 8, 8), dtype=jnp.float32)
    out3 = jax.block_until_ready(
        downsample_b(x3, conv_weight, mask, gamma, beta, 1))
    ref3 = reference(x3, conv_weight, mask, gamma, beta, 1)
    assert jnp.allclose(out3, ref3, atol=1e-4, rtol=1e-4), \
        float(jnp.max(jnp.abs(out3 - ref3)))

    print("KERNEL_OK")
</pallas_src>

<mosaic_0001>
module attributes {stable_mosaic.version = 11 : i64} {
  func.func @stats_kernel(%arg0: i32, %arg1: i32, %arg2: memref<4x128xf32, #tpu.memory_space<vmem>>, %arg3: memref<1x4x1xf32, #tpu.memory_space<vmem>>, %arg4: memref<1x4x4xf32, #tpu.memory_space<vmem>>) attributes {dimension_semantics = [#tpu.dimension_semantics<parallel>, #tpu.dimension_semantics<arbitrary>], iteration_bounds = array<i64: 2, 1>, scalar_prefetch = 0 : i64, scratch_operands = 0 : i64, tpu.core_type = #tpu.core_type<tc>, window_params = [{transform_indices = @transform_0, window_bounds = array<i64: 4, 128>}, {transform_indices = @transform_1, window_bounds = array<i64: 1, 4, 1>}, {transform_indices = @transform_2, window_bounds = array<i64: 1, 4, 4>}]} {
    %c0_i32 = arith.constant 0 : i32
    %0 = arith.cmpi eq, %arg1, %c0_i32 : i32
    %1 = arith.extui %0 : i1 to i32
    %c0_i32_0 = arith.constant 0 : i32
    %2 = arith.cmpi ne, %1, %c0_i32_0 : i32
    scf.if %2 {
      %cst_15 = arith.constant 0.000000e+00 : f32
      %19 = vector.broadcast %cst_15 : f32 to vector<4x1xf32>
      %c0_16 = arith.constant 0 : index
      %c0_17 = arith.constant 0 : index
      %c0_18 = arith.constant 0 : index
      %20 = vector.load %arg3[%c0_16, %c0_17, %c0_18] : memref<1x4x1xf32, #tpu.memory_space<vmem>>, vector<1x4x1xf32>
      %21 = vector.shape_cast %20 : vector<1x4x1xf32> to vector<4x1xf32>
      %22 = vector.shape_cast %19 : vector<4x1xf32> to vector<1x4x1xf32>
      tpu.vector_store %arg3[%c0_16, %c0_17, %c0_18], %22 {strides = array<i32>} : memref<1x4x1xf32, #tpu.memory_space<vmem>>, vector<1x4x1xf32>,
      %cst_19 = arith.constant 0.000000e+00 : f32
      %23 = vector.broadcast %cst_19 : f32 to vector<4x4xf32>
      %c0_20 = arith.constant 0 : index
      %c0_21 = arith.constant 0 : index
      %c0_22 = arith.constant 0 : index
      %24 = vector.load %arg4[%c0_20, %c0_21, %c0_22] : memref<1x4x4xf32, #tpu.memory_space<vmem>>, vector<1x4x4xf32>
      %25 = vector.shape_cast %24 : vector<1x4x4xf32> to vector<4x4xf32>
      %26 = vector.shape_cast %23 : vector<4x4xf32> to vector<1x4x4xf32>
      tpu.vector_store %arg4[%c0_20, %c0_21, %c0_22], %26 {strides = array<i32>} : memref<1x4x4xf32, #tpu.memory_space<vmem>>, vector<1x4x4xf32>,
    } else {
    }
    %c0 = arith.constant 0 : index
    %c0_1 = arith.constant 0 : index
    %3 = vector.load %arg2[%c0, %c0_1] : memref<4x128xf32, #tpu.memory_space<vmem>>, vector<4x128xf32>
    %c0_2 = arith.constant 0 : index
    %c0_3 = arith.constant 0 : index
    %c0_4 = arith.constant 0 : index
    %4 = vector.load %arg3[%c0_2, %c0_3, %c0_4] : memref<1x4x1xf32, #tpu.memory_space<vmem>>, vector<1x4x1xf32>
    %5 = vector.shape_cast %4 : vector<1x4x1xf32> to vector<4x1xf32>
    %cst = arith.constant dense<0.000000e+00> : vector<4xf32>
    %6 = vector.multi_reduction <add>, %3, %cst [1] : vector<4x128xf32> to vector<4xf32>
    %7 = vector.shape_cast %6 : vector<4xf32> to vector<4x1xf32>
    %8 = arith.addf %5, %7 : vector<4x1xf32>
    %c0_5 = arith.constant 0 : index
    %c0_6 = arith.constant 0 : index
    %c0_7 = arith.constant 0 : index
    %9 = vector.load %arg3[%c0_5, %c0_6, %c0_7] : memref<1x4x1xf32, #tpu.memory_space<vmem>>, vector<1x4x1xf32>
    %10 = vector.shape_cast %9 : vector<1x4x1xf32> to vector<4x1xf32>
    %11 = vector.shape_cast %8 : vector<4x1xf32> to vector<1x4x1xf32>
    tpu.vector_store %arg3[%c0_5, %c0_6, %c0_7], %11 {strides = array<i32>} : memref<1x4x1xf32, #tpu.memory_space<vmem>>, vector<1x4x1xf32>,
    %c0_8 = arith.constant 0 : index
    %c0_9 = arith.constant 0 : index
    %c0_10 = arith.constant 0 : index
    %12 = vector.load %arg4[%c0_8, %c0_9, %c0_10] : memref<1x4x4xf32, #tpu.memory_space<vmem>>, vector<1x4x4xf32>
    %13 = vector.shape_cast %12 : vector<1x4x4xf32> to vector<4x4xf32>
    %cst_11 = arith.constant dense<0.000000e+00> : vector<4x4xf32>
    %14 = tpu.matmul %3, %3, %cst_11 {dimension_numbers = #tpu.dot_dimension_numbers<[1], [1], [0], [0], [0, 0, 1, 0], [], []>} : vector<4x128xf32>, vector<4x128xf32>, vector<4x4xf32> -> vector<4x4xf32>
    %15 = arith.addf %13, %14 : vector<4x4xf32>
    %c0_12 = arith.constant 0 : index
    %c0_13 = arith.constant 0 : index
    %c0_14 = arith.constant 0 : index
    %16 = vector.load %arg4[%c0_12, %c0_13, %c0_14] : memref<1x4x4xf32, #tpu.memory_space<vmem>>, vector<1x4x4xf32>
    %17 = vector.shape_cast %16 : vector<1x4x4xf32> to vector<4x4xf32>
    %18 = vector.shape_cast %15 : vector<4x4xf32> to vector<1x4x4xf32>
    tpu.vector_store %arg4[%c0_12, %c0_13, %c0_14], %18 {strides = array<i32>} : memref<1x4x4xf32, #tpu.memory_space<vmem>>, vector<1x4x4xf32>,
    return
  }
  func.func @transform_0(%arg0: i32, %arg1: i32) -> (i32, i32) {
    %c1_i32 = arith.constant 1 : i32
    %0 = arith.muli %arg0, %c1_i32 : i32
    %1 = arith.addi %0, %arg1 : i32
    %c0_i32 = arith.constant 0 : i32
    %c0_i32_0 = arith.constant 0 : i32
    return %c0_i32, %1 : i32, i32
  }
  func.func @transform_1(%arg0: i32, %arg1: i32) -> (i32, i32, i32) {
    %c0_i32 = arith.constant 0 : i32
    %c0_i32_0 = arith.constant 0 : i32
    %c0_i32_1 = arith.constant 0 : i32
    return %arg0, %c0_i32, %c0_i32_0 : i32, i32, i32
  }
  func.func @transform_2(%arg0: i32, %arg1: i32) -> (i32, i32, i32) {
    %c0_i32 = arith.constant 0 : i32
    %c0_i32_0 = arith.constant 0 : i32
    %c0_i32_1 = arith.constant 0 : i32
    return %arg0, %c0_i32, %c0_i32_0 : i32, i32, i32
  }
}

</mosaic_0001>

<bundles_post_ra>
// kernel: tpu_custom_call.1
= control target key start
LH: loop header
LB: loop body
LE: loop exit
PB: predicated region body
PF: predicated region fallthrough
CT: control target
= control target key end

     0   :  { %8 = vsyncpa [#allocation3], 0  ;;  %s798_s0 = inlined_call_operand.hbm [shape: f32[4,256], index: 0, kind: input, shape index: {}]   ;;  %s799_s1 = inlined_call_operand.vmem [shape: f32[2,4,1], index: 1, kind: output, shape index: {0}]   ;;  %s800_s2 = inlined_call_operand.hbm [shape: f32[2,4,4], index: 2, kind: output, shape index: {1}]  }
   0x1   :  { %10 = vsyncpa [#allocation3 + $0x1], 0 }
   0x2   :  { %11 = vsyncpa [#allocation4], 0 }
   0x3   :  { %13 = vsyncpa [#allocation4 + $0x1], 0  ;;  %s619_s9 = smov 0   ;;  %s621_s10 = smov 0  }
   0x4   :  { %s623_s11 = smov 0   ;;  %s625_s12 = smov 0  }
   0x5   :  { %s627_s13 = smov 0   ;;  %s629_s14 = smov 0  }
   0x6 LB: > { %s401_s15 = sadd.s32 4294967295, %s598_s14   ;;  %s402_s16 = sadd.s32 4294967294, %s598_s14   ;;  %s598_s14 = sphi %s629_s14, %s19_s14   ;;  %s594_s13 = sphi %s627_s13, %s816_s13   ;;  %s590_s12 = sphi %s625_s12, %s815_s12   ;;  %s586_s11 = sphi %s623_s11, %s814_s11   ;;  %s582_s10 = sphi %s621_s10, %s813_s10   ;;  %s578_s9 = sphi %s619_s9, %s812_s9  }
   0x7   : > { %s31_s17 = sadd.s32 1, %s594_s13  ;;  %s40_s18 = sadd.s32 1, %s586_s11 }
   0x8   : > { %p33_p0 = scmp.ge.s32.totalorder %s31_s17, 2  ;;  %p47_p1 = scmp.ne.s32.totalorder %s586_s11, %s582_s10 }
   0x9   : > { %p48_p2 = scmp.eq.s32.totalorder %s598_s14, 0  ;;  %p53_p3 = scmp.ne.s32.totalorder %s582_s10, %s578_s9 }
   0xa   : > { %s818_s17 = smov (%p33_p0, %s31_s17), 0  ;;  %p54_p5 = scmp.eq.s32.totalorder %s401_s15, 0 }
   0xb   : > { %p660_p4 = por %p48_p2, %p47_p1  ;;  %s37_s20 = ssub.s32 %s594_s13, %s818_s17 }
   0xc   : > { %p103_p6 = scmp.eq.s32.totalorder %s401_s15, 1  ;;  %p38_p7 = scmp.eq.s32.totalorder %s37_s20, 0 }
   0xd   : > { %p666_p8 = por %p54_p5, %p53_p3  ;;  %p109_p10 = scmp.eq.s32.totalorder %s402_s16, 1 }
   0xe   : > { %p670_p9 = por %p103_p6, %p47_p1  ;;  %p434_p13 = scmp.lt.s32.totalorder %s598_s14, 2 }
   0xf   : > { %s675_s23 = scalar_select %p38_p7, %s586_s11, %s40_s18  }
  0x10   : > { %s804_s22 = scalar_select %p670_p9, 1, 0 }
  0x11   : > { %p677_p11 = por %p109_p10, %p53_p3  ;;  %s129_s25 = sand.u32 1, %s586_s11  }
  0x12   : > { %s405_s26 = sshll.u32 %s129_s25, 2  ;;  %s406_s27 = sshll.u32 %s594_s13, 6 }
  0x13   : > { %s805_s24 = scalar_select %p677_p11, 1, 0 }
  0x14   : > { %s688_s30 = scalar_lea.hbm %s798_s0, %s406_s27  ;;  %s133_s3 = scalar_lea.vmem [#allocation2], %s405_s26 }
  0x15   : > { %s141_s4 = sshll.u32 %s133_s3, 4  ;;  %p694_p0 = pnand %p434_p13, %p660_p4  ;;  %s690_s4 = int_to_ptr.vmem [resolvable:$true] %s141_s4 }
  0x16   : > { %s130_s6 = scalar_lea.sflag [#allocation3], %s129_s25  ;;  %s486_s7 = scalar_lea.hbm %s688_s30, 64 }
  0x17   : > { %p487_p3 = scmp.ne.s32.totalorder %s688_s30, %s486_s7  ;;  %p488_p5 = pneg %p694_p0 }
  0x18   : > { %s491_s16 = scalar_lea.hbm %s798_s0, 128  ;;  %p492_p4 = scmp.lt.u32.totalorder %s688_s30, %s798_s0 }
  0x19   : > { %p489_p6 = pnand %p488_p5, %p487_p3  ;;  %p493_p10 = scmp.lt.u32.totalorder %s491_s16, %s486_s7 }
  0x1a   : > { %p495_p12 = scmp.lt.u32.totalorder %s486_s7, %s688_s30 }
  0x1b   : > { %p490_p7 = pneg %p489_p6  ;;  %p494_p13 = por %p493_p10, %p492_p4 }
  0x1d   : > { %p496_p1 = por %p495_p12, %p494_p13 }
  0x1f   : > { %p497_p2 = pnand %p496_p1, %p490_p7 }
  0x21   : > { %500 = shalt.err (!%p497_p2)
}
  0x22   : > { %s501_s20 = scalar_lea.vmem %s690_s4, 64  ;;  %s600_s25 = smov [#allocation2]  }
  0x23   : > { %p502_p3 = scmp.ne.s32.totalorder %s690_s4, %s501_s20  ;;  %s506_s26 = sshll.u32 %s600_s25, 4  ;;  %s507_s26 = int_to_ptr.vmem [resolvable:$false] %s506_s26 }
  0x24   : > { %s508_s27 = scalar_lea.vmem %s507_s26, 128  ;;  %p509_p9 = scmp.lt.s32.totalorder %s690_s4, %s507_s26 }
  0x25   : > { %p504_p6 = pnand %p502_p3, %p488_p5  ;;  %p510_p4 = scmp.lt.s32.totalorder %s508_s27, %s501_s20 }
  0x27   : > { %p505_p11 = pneg %p504_p6  ;;  %p511_p10 = por %p510_p4, %p509_p9 }
  0x29   : > { %p512_p12 = pnand %p511_p10, %p505_p11 }
  0x2b   : > { %515 = shalt.err (!%p512_p12)
}
  0x2c   : > { %429 = dma.hbm_to_vmem [thread:$0]  (!%p694_p0), %s688_s30, 64, %s690_s4, %s130_s6  }
  0x2d   : > { %p807_p1 = scmp.lt.s32.totalorder %s598_s14, 3  ;;  %p808_p2 = scmp.ge.s32.totalorder %s598_s14, 1 }
  0x2f   : > { %p147_p5 = pnand %p808_p2, %p807_p1 }
  0x30   : > { %s730_s28 = sand.u32 (!%p147_p5), 1, %s582_s10  }
  0x31   : > { %150 = sbr.rel (%p147_p5) target bundleno = 290 (0x122), region = 24  ;;  %s408_s29 = sshll.u32 (!%p147_p5), %s730_s28, 2 }
  0x32   : > { %s153_s3 = scalar_lea.sflag (!%p147_p5), [#allocation3], %s730_s28  ;;  %s156_s7 = scalar_lea.vmem (!%p147_p5), [#allocation2], %s408_s29 }
  0x38   : > { %569 = dma.done.wait (%p666_p8), %s153_s3, 64  }
  0x39   : > { %571 = vsyncadd (%p666_p8), %s153_s3, 4294967232  ;;  %vm192_vm0 = vcmask 27648   ;;  %v601_v0 = vmov 0.0   ;;  %vm602_vm1 = vmmov 0   ;;  %s180_s30 = scalar_lea.vmem [#allocation5], %s408_s29  ;;  %vm196_vm2 = vcmask 1043456  }
  0x3a   : > { %417 = vmatprep.subr.mxu0 %v601_v0  ;;  %419 = vmatprep.mubr.msk.f32.mxu0 %vm602_vm1, %v601_v0  ;;  %193 = vst.msk [vmem:[%s180_s30] sm:$0xf] %vm192_vm0, %v601_v0  ;;  %v194_v1 = vld [vmem:[%s156_s7] sm:$0xf]  ;;  %p182_p9 = scmp.lt.s32.totalorder %s590_s12, 1  ;;  %vm190_vm3 = vcmask 3072  }
  0x3b   : > { %418 = vmatpush3.xpose.msra.mxu0 %v194_v1  ;;  %v197_v2 = vsel %vm196_vm2, %v194_v1, 0.0  ;;  %s412_s15 = sshll.u32 %s590_s12, 6  ;;  %s298_s16 = sshll.u32 %s180_s30, 4  ;;  %s750_s16 = int_to_ptr.vmem [resolvable:$true] %s298_s16 }
  0x3c   : > { %198 = vadd.xlane.f32.xlu0 %v197_v2  ;;  %s183_s21 = scalar_select %p182_p9, %s590_s12, 1 }
  0x3d   : > { %s748_s20 = scalar_lea.hbm %s800_s2, %s412_s15  ;;  %s282_s25 = scalar_lea.sflag [#allocation4], %s730_s28 }
  0x3e   : > { %420 = vmatmul.mubr.f32.vlgmr.msra.gmra.mrb[0].mxu0 %v194_v1  ;;  %s410_s4 = sshll.u32 %s183_s21, 2  ;;  %s516_s26 = scalar_lea.vmem %s750_s16, 64 }
  0x3f   : > { %s185_s8 = scalar_lea.vmem %s799_s1, %s410_s4  ;;  %p517_p8 = scmp.ne.s32.totalorder %s750_s16, %s516_s26 }
  0x40   : > { %191 = vst.msk [vmem:[%s185_s8] sm:$0xf] %vm190_vm3, %v601_v0  ;;  %p809_p11 = scmp.ne.s32.totalorder %s804_s22, 0  ;;  %s603_s12 = smov [#allocation5]  }
  0x41   : > { %v203_v6 = vld [vmem:[%s180_s30] sm:$0xf]  ;;  %s520_s27 = sshll.u32 %s603_s12, 4  ;;  %s521_s27 = int_to_ptr.vmem [resolvable:$false] %s520_s27 }
  0x42   : > { %p518_p0 = pnand %p517_p8, %p809_p11  ;;  %s522_s29 = scalar_lea.vmem %s521_s27, 128 }
  0x43   : > { %p523_p13 = scmp.lt.s32.totalorder %s750_s16, %s521_s27  ;;  %p524_p3 = scmp.lt.s32.totalorder %s522_s29, %s516_s26 }
  0x44   : > { %p519_p7 = pneg %p518_p0 }
  0x45   : > { %p525_p6 = por %p524_p3, %p523_p13 }
  0x47   : > { %v195_v3 = vld [vmem:[%s185_s8] sm:$0xf]  ;;  %p526_p4 = pnand %p525_p6, %p519_p7 }
  0xc9   : > { %v199_v4 = vpop.xlane.xlu0 %198 }
  0xca   : > { %v200_v5 = vadd.f32 %v199_v4, %v195_v3 }
  0xcc   : > { %202 = vst.msk [vmem:[%s185_s8] sm:$0xf] %vm190_vm3, %v200_v5 }
 0x111   : > { %v270_v7 = vpop.f32.mrb[0].mxu0 }
 0x112   : > { %v274_v8 = vadd.f32 %v270_v7, %v203_v6  ;;  %v421_v9 = vpop.f32.mrb[1].mxu0 }
 0x114   : > { %276 = vst.msk [vmem:[%s180_s30] sm:$0xf] %vm192_vm0, %v274_v8 }
 0x115   : > { %529 = shalt.err (!%p526_p4)
}
 0x116   : > { %s530_s28 = scalar_lea.hbm %s748_s20, 64  ;;  %s534_s30 = scalar_lea.hbm %s800_s2, 128 }
 0x117   : > { %p531_p10 = scmp.ne.s32.totalorder %s748_s20, %s530_s28  ;;  %p535_p2 = scmp.lt.u32.totalorder %s748_s20, %s800_s2 }
 0x118   : > { %p536_p5 = scmp.lt.u32.totalorder %s534_s30, %s530_s28  ;;  %p538_p8 = scmp.lt.u32.totalorder %s530_s28, %s748_s20 }
 0x119   : > { %p532_p12 = pnand %p531_p10, %p809_p11 }
 0x11a   : > { %p537_p9 = por %p536_p5, %p535_p2 }
 0x11b   : > { %p533_p1 = pneg %p532_p12 }
 0x11c   : > { %p539_p0 = por %p538_p8, %p537_p9 }
 0x11e   : > { %p540_p7 = pnand %p539_p0, %p533_p1 }
 0x120   : > { %543 = shalt.err (!%p540_p7)
}
 0x121   : > { %424 = dma.vmem_to_hbm [thread:$0]  (%p809_p11), %s750_s16, 64, %s748_s20, %s282_s25  }
 0x122 PF: > { %s317_s5 = sand.u32 1, %s578_s9   ;;  %p810_p13 = scmp.ne.s32.totalorder %s805_s24, 0 }
 0x123   : > { %p811_p3 = scmp.ge.s32.totalorder %s598_s14, 2  ;;  %s318_s6 = scalar_lea.sflag [#allocation4], %s317_s5 }
 0x125   : > { %p431_p6 = pnand %p811_p3, %p810_p13 }
 0x127   : > { %573 = dma.done.wait (!%p431_p6), %s318_s6, 64  }
 0x128   : > { %575 = vsyncadd (!%p431_p6), %s318_s6, 4294967232  ;;  %s19_s14 = sadd.s32 1, %s598_s14   ;;  %s812_s9 = smov %s582_s10 }
 0x129   : > { %p16_p4 = scmp.ge.s32.totalorder %s19_s14, 4   ;;  %s813_s10 = smov %s586_s11 }
 0x12a   : > { %s814_s11 = smov %s675_s23  ;;  %s815_s12 = smov %s594_s13 }
 0x12b   : > { %s816_s13 = smov %s818_s17  ;;  %18 = sbr.rel (!%p16_p4) target bundleno = 6 (0x6), region = 85 }
 0x132   :  { %323 = vsyncpa [#allocation3], 1 }
 0x133   :  { %325 = vsyncpa [#allocation3 + $0x1], 1 }
 0x134   :  { %326 = vsyncpa [#allocation4], 1 }
 0x135   :  { %328 = vsyncpa [#allocation4 + $0x1], 1 }

</bundles_post_ra>
